<compile_context>
chip_gen: v6e
topology: v6e:2x2x1
jax: 0.10.0
libtpu: 0.0.40
codegen_flags: <defaults>
</compile_context>

<pallas_src>
import numpy as np
import jax
import jax.numpy as jnp
from jax.experimental import pallas as pl
from jax.experimental.pallas import tpu as pltpu

# Small, module-consistent sizes.
B, T, FEAT = 2, 8, 9     # batch, timesteps, feature_size
H = 32                   # hidden_size; 4H = 128 = one vreg lane width / one v5e MXU pass
DP = 16                  # padded input dim: FEAT + 1 (ones column for bias), rounded to 8


def encoder_lstm_kernel(xs_ref, w_ref, out_ref):
    """xs_ref : (T*B, DP)      time-major inputs + ones column + zero pad
       w_ref  : (DP + 4H, 4H)  rows [0:FEAT)=W_ih^T, row FEAT=b_ih+b_hh, zero pad,
                               rows [DP:DP+H)=W_hh^T, rows [DP+H:DP+4H)=0
       out_ref: (2, B, H)      out[0]=final hidden, out[1]=final cell
    """
    four_h = w_ref.shape[1]
    h_dim = four_h // 4
    dp = xs_ref.shape[1]
    b_sz = out_ref.shape[1]
    t_len = xs_ref.shape[0] // b_sz

    w_in = w_ref[0:dp, :]                 # (DP, 4H)   -- 8-aligned static slice
    w_hh = w_ref[dp:dp + four_h, :]       # (4H, 4H)   -- rows >= H are zero

    # Hoisted input projection (+bias via the ones column): ONE matmul for all steps.
    gates_x = jnp.dot(xs_ref[...], w_in, preferred_element_type=jnp.float32)  # (T*B, 4H)
    gx = [gates_x[t * b_sz:(t + 1) * b_sz, :] for t in range(t_len)]  # static, off crit path

    # State kept (B, 4H)-wide; only lanes [0:H) are meaningful.  Junk lanes stay
    # bounded and are multiplied by the zero rows of w_hh in the next matmul.
    h = jnp.zeros((b_sz, four_h), jnp.float32)
    c = jnp.zeros((b_sz, four_h), jnp.float32)

    # Fully unrolled recurrence (static trip count) -> per-step static slices and
    # full scheduler visibility across steps.
    for t in range(t_len):
        if t == 0:
            gates = gx[0]                                     # h0 == 0: skip the matmul
        else:
            gates = jnp.dot(h, w_hh, preferred_element_type=jnp.float32) + gx[t]
        # PyTorch gate layout along lanes: [i | f | g | o], each H wide.
        sig = jax.nn.sigmoid(gates)      # full-vreg EUP: i, f, o
        th = jnp.tanh(gates)             # full-vreg EUP: g
        f_al = pltpu.roll(sig, shift=3 * h_dim, axis=1)       # block 1 (f) -> block 0
        g_al = pltpu.roll(th, shift=2 * h_dim, axis=1)        # block 2 (g) -> block 0
        o_al = pltpu.roll(sig, shift=1 * h_dim, axis=1)       # block 3 (o) -> block 0
        c = f_al * c + sig * g_al        # lanes [0:H): f*c + i*g
        h = o_al * jnp.tanh(c)           # lanes [0:H): o*tanh(c)

    out_ref[0] = h[:, 0:h_dim]
    out_ref[1] = c[:, 0:h_dim]


def init_params(key):
    """PyTorch-style uniform(-1/sqrt(H), 1/sqrt(H)) init, deterministic."""
    k = 1.0 / np.sqrt(H)
    ks = jax.random.split(key, 4)
    u = lambda kk, shape: jax.random.uniform(kk, shape, jnp.float32, -k, k)
    return dict(
        w_ih=u(ks[0], (4 * H, FEAT)),   # weight_ih_l0
        w_hh=u(ks[1], (4 * H, H)),      # weight_hh_l0
        b_ih=u(ks[2], (4 * H,)),        # bias_ih_l0
        b_hh=u(ks[3], (4 * H,)),        # bias_hh_l0
    )


def encoder_forward(xs, params):
    """xs: (B, T, FEAT) float32, batch-first. Returns (hidden, cell), each (1, B, H)."""
    xs = xs.astype(jnp.float32)
    b, t, feat = xs.shape
    h = params["w_hh"].shape[1]
    fh = 4 * h
    dp = DP
    assert dp >= feat + 1 and dp % 8 == 0 and fh % 128 == 0

    # Time-major flatten + ones column (folds bias into the input GEMM) + zero pad.
    xs_tm = jnp.transpose(xs, (1, 0, 2)).reshape(t * b, feat)
    xs_aug = jnp.concatenate(
        [xs_tm, jnp.ones((t * b, 1), jnp.float32),
         jnp.zeros((t * b, dp - feat - 1), jnp.float32)], axis=1)          # (T*B, DP)

    # Pack all weights into one VMEM operand with 8-aligned row offsets.
    w_packed = jnp.zeros((dp + fh, fh), jnp.float32)
    w_packed = w_packed.at[:feat, :].set(params["w_ih"].T)                  # W_ih^T
    w_packed = w_packed.at[feat, :].set(params["b_ih"] + params["b_hh"])    # fused bias
    w_packed = w_packed.at[dp:dp + h, :].set(params["w_hh"].T)              # W_hh^T (rest 0)

    vmem = pl.BlockSpec(memory_space=pltpu.MemorySpace.VMEM)
    out = pl.pallas_call(
        encoder_lstm_kernel,
        out_shape=jax.ShapeDtypeStruct((2, b, h), jnp.float32),
        in_specs=[vmem, vmem],
        out_specs=vmem,
    )(xs_aug, w_packed)

    hidden = out[0][None]   # (1, B, H), like PyTorch nn.LSTM (num_layers=1)
    cell = out[1][None]
    return hidden, cell


def encoder_reference(xs, params):
    """Pure-JAX reference of the same forward pass (for verification)."""
    w_ih, w_hh = params["w_ih"], params["w_hh"]
    bias = params["b_ih"] + params["b_hh"]
    bsz, t_len, _ = xs.shape
    hdim = w_hh.shape[1]
    h = jnp.zeros((bsz, hdim), jnp.float32)
    c = jnp.zeros((bsz, hdim), jnp.float32)
    for t in range(t_len):
        gates = xs[:, t, :] @ w_ih.T + h @ w_hh.T + bias
        i = jax.nn.sigmoid(gates[:, 0 * hdim:1 * hdim])
        f = jax.nn.sigmoid(gates[:, 1 * hdim:2 * hdim])
        g = jnp.tanh(gates[:, 2 * hdim:3 * hdim])
        o = jax.nn.sigmoid(gates[:, 3 * hdim:4 * hdim])
        c = f * c + i * g
        h = o * jnp.tanh(c)
    return h[None], c[None]


if __name__ == "__main__":
    key = jax.random.PRNGKey(0)
    kx, kp = jax.random.split(key)
    xs = jax.random.normal(kx, (B, T, FEAT), jnp.float32)
    params = init_params(kp)

    hidden, cell = encoder_forward(xs, params)
    hidden, cell = jax.block_until_ready((hidden, cell))

    h_ref, c_ref = encoder_reference(xs, params)
    np.testing.assert_allclose(np.asarray(hidden), np.asarray(h_ref), rtol=2e-3, atol=2e-3)
    np.testing.assert_allclose(np.asarray(cell), np.asarray(c_ref), rtol=2e-3, atol=2e-3)
    assert hidden.shape == (1, B, H) and cell.shape == (1, B, H)
    print("KERNEL_OK")
</pallas_src>

<mosaic_0001>
module attributes {stable_mosaic.version = 11 : i64} {
  func.func @encoder_lstm_kernel(%arg0: memref<16x16xf32, #tpu.memory_space<vmem>>, %arg1: memref<144x128xf32, #tpu.memory_space<vmem>>, %arg2: memref<2x2x32xf32, #tpu.memory_space<vmem>>) attributes {dimension_semantics = [], scalar_prefetch = 0 : i64, scratch_operands = 0 : i64, tpu.core_type = #tpu.core_type<tc>} {
    %c0 = arith.constant 0 : index
    %c0_0 = arith.constant 0 : index
    %0 = vector.load %arg1[%c0, %c0_0] : memref<144x128xf32, #tpu.memory_space<vmem>>, vector<16x128xf32>
    %c16 = arith.constant 16 : index
    %c0_1 = arith.constant 0 : index
    %1 = vector.load %arg1[%c16, %c0_1] : memref<144x128xf32, #tpu.memory_space<vmem>>, vector<128x128xf32>
    %c0_2 = arith.constant 0 : index
    %c0_3 = arith.constant 0 : index
    %2 = vector.load %arg0[%c0_2, %c0_3] : memref<16x16xf32, #tpu.memory_space<vmem>>, vector<16x16xf32>
    %cst = arith.constant dense<0.000000e+00> : vector<16x128xf32>
    %3 = tpu.matmul %2, %0, %cst {dimension_numbers = #tpu.dot_dimension_numbers<[1], [0], [0], [1], [0, 0, 1, 1], [], []>} : vector<16x16xf32>, vector<16x128xf32>, vector<16x128xf32> -> vector<16x128xf32>
    %4 = vector.extract_strided_slice %3 {offsets = [0, 0], sizes = [2, 128], strides = [1, 1]} : vector<16x128xf32> to vector<2x128xf32>
    %5 = vector.extract_strided_slice %3 {offsets = [2, 0], sizes = [2, 128], strides = [1, 1]} : vector<16x128xf32> to vector<2x128xf32>
    %6 = vector.extract_strided_slice %3 {offsets = [4, 0], sizes = [2, 128], strides = [1, 1]} : vector<16x128xf32> to vector<2x128xf32>
    %7 = vector.extract_strided_slice %3 {offsets = [6, 0], sizes = [2, 128], strides = [1, 1]} : vector<16x128xf32> to vector<2x128xf32>
    %8 = vector.extract_strided_slice %3 {offsets = [8, 0], sizes = [2, 128], strides = [1, 1]} : vector<16x128xf32> to vector<2x128xf32>
    %9 = vector.extract_strided_slice %3 {offsets = [10, 0], sizes = [2, 128], strides = [1, 1]} : vector<16x128xf32> to vector<2x128xf32>
    %10 = vector.extract_strided_slice %3 {offsets = [12, 0], sizes = [2, 128], strides = [1, 1]} : vector<16x128xf32> to vector<2x128xf32>
    %11 = vector.extract_strided_slice %3 {offsets = [14, 0], sizes = [2, 128], strides = [1, 1]} : vector<16x128xf32> to vector<2x128xf32>
    %cst_4 = arith.constant 0.000000e+00 : f32
    %12 = vector.broadcast %cst_4 : f32 to vector<2x128xf32>
    %13 = arith.negf %4 : vector<2x128xf32>
    %14 = math.exp %13 : vector<2x128xf32>
    %cst_5 = arith.constant 1.000000e+00 : f32
    %15 = vector.broadcast %cst_5 : f32 to vector<2x128xf32>
    %16 = arith.addf %15, %14 : vector<2x128xf32>
    %17 = arith.divf %15, %16 : vector<2x128xf32>
    %18 = math.tanh %4 : vector<2x128xf32>
    %c96_i32 = arith.constant 96 : i32
    %19 = tpu.dynamic_rotate %17 by %c96_i32 dim 1 : vector<2x128xf32>, i32 -> vector<2x128xf32>
    %c64_i32 = arith.constant 64 : i32
    %20 = tpu.dynamic_rotate %18 by %c64_i32 dim 1 : vector<2x128xf32>, i32 -> vector<2x128xf32>
    %c32_i32 = arith.constant 32 : i32
    %21 = tpu.dynamic_rotate %17 by %c32_i32 dim 1 : vector<2x128xf32>, i32 -> vector<2x128xf32>
    %22 = arith.mulf %19, %12 : vector<2x128xf32>
    %23 = arith.mulf %17, %20 : vector<2x128xf32>
    %24 = arith.addf %22, %23 : vector<2x128xf32>
    %25 = math.tanh %24 : vector<2x128xf32>
    %26 = arith.mulf %21, %25 : vector<2x128xf32>
    %cst_6 = arith.constant dense<0.000000e+00> : vector<2x128xf32>
    %27 = tpu.matmul %26, %1, %cst_6 {dimension_numbers = #tpu.dot_dimension_numbers<[1], [0], [0], [1], [0, 0, 1, 1], [], []>} : vector<2x128xf32>, vector<128x128xf32>, vector<2x128xf32> -> vector<2x128xf32>
    %28 = arith.addf %27, %5 : vector<2x128xf32>
    %29 = arith.negf %28 : vector<2x128xf32>
    %30 = math.exp %29 : vector<2x128xf32>
    %cst_7 = arith.constant 1.000000e+00 : f32
    %31 = vector.broadcast %cst_7 : f32 to vector<2x128xf32>
    %32 = arith.addf %31, %30 : vector<2x128xf32>
    %33 = arith.divf %31, %32 : vector<2x128xf32>
    %34 = math.tanh %28 : vector<2x128xf32>
    %c96_i32_8 = arith.constant 96 : i32
    %35 = tpu.dynamic_rotate %33 by %c96_i32_8 dim 1 : vector<2x128xf32>, i32 -> vector<2x128xf32>
    %c64_i32_9 = arith.constant 64 : i32
    %36 = tpu.dynamic_rotate %34 by %c64_i32_9 dim 1 : vector<2x128xf32>, i32 -> vector<2x128xf32>
    %c32_i32_10 = arith.constant 32 : i32
    %37 = tpu.dynamic_rotate %33 by %c32_i32_10 dim 1 : vector<2x128xf32>, i32 -> vector<2x128xf32>
    %38 = arith.mulf %35, %24 : vector<2x128xf32>
    %39 = arith.mulf %33, %36 : vector<2x128xf32>
    %40 = arith.addf %38, %39 : vector<2x128xf32>
    %41 = math.tanh %40 : vector<2x128xf32>
    %42 = arith.mulf %37, %41 : vector<2x128xf32>
    %cst_11 = arith.constant dense<0.000000e+00> : vector<2x128xf32>
    %43 = tpu.matmul %42, %1, %cst_11 {dimension_numbers = #tpu.dot_dimension_numbers<[1], [0], [0], [1], [0, 0, 1, 1], [], []>} : vector<2x128xf32>, vector<128x128xf32>, vector<2x128xf32> -> vector<2x128xf32>
    %44 = arith.addf %43, %6 : vector<2x128xf32>
    %45 = arith.negf %44 : vector<2x128xf32>
    %46 = math.exp %45 : vector<2x128xf32>
    %cst_12 = arith.constant 1.000000e+00 : f32
    %47 = vector.broadcast %cst_12 : f32 to vector<2x128xf32>
    %48 = arith.addf %47, %46 : vector<2x128xf32>
    %49 = arith.divf %47, %48 : vector<2x128xf32>
    %50 = math.tanh %44 : vector<2x128xf32>
    %c96_i32_13 = arith.constant 96 : i32
    %51 = tpu.dynamic_rotate %49 by %c96_i32_13 dim 1 : vector<2x128xf32>, i32 -> vector<2x128xf32>
    %c64_i32_14 = arith.constant 64 : i32
    %52 = tpu.dynamic_rotate %50 by %c64_i32_14 dim 1 : vector<2x128xf32>, i32 -> vector<2x128xf32>
    %c32_i32_15 = arith.constant 32 : i32
    %53 = tpu.dynamic_rotate %49 by %c32_i32_15 dim 1 : vector<2x128xf32>, i32 -> vector<2x128xf32>
    %54 = arith.mulf %51, %40 : vector<2x128xf32>
    %55 = arith.mulf %49, %52 : vector<2x128xf32>
    %56 = arith.addf %54, %55 : vector<2x128xf32>
    %57 = math.tanh %56 : vector<2x128xf32>
    %58 = arith.mulf %53, %57 : vector<2x128xf32>
    %cst_16 = arith.constant dense<0.000000e+00> : vector<2x128xf32>
    %59 = tpu.matmul %58, %1, %cst_16 {dimension_numbers = #tpu.dot_dimension_numbers<[1], [0], [0], [1], [0, 0, 1, 1], [], []>} : vector<2x128xf32>, vector<128x128xf32>, vector<2x128xf32> -> vector<2x128xf32>
    %60 = arith.addf %59, %7 : vector<2x128xf32>
    %61 = arith.negf %60 : vector<2x128xf32>
    %62 = math.exp %61 : vector<2x128xf32>
    %cst_17 = arith.constant 1.000000e+00 : f32
    %63 = vector.broadcast %cst_17 : f32 to vector<2x128xf32>
    %64 = arith.addf %63, %62 : vector<2x128xf32>
    %65 = arith.divf %63, %64 : vector<2x128xf32>
    %66 = math.tanh %60 : vector<2x128xf32>
    %c96_i32_18 = arith.constant 96 : i32
    %67 = tpu.dynamic_rotate %65 by %c96_i32_18 dim 1 : vector<2x128xf32>, i32 -> vector<2x128xf32>
    %c64_i32_19 = arith.constant 64 : i32
    %68 = tpu.dynamic_rotate %66 by %c64_i32_19 dim 1 : vector<2x128xf32>, i32 -> vector<2x128xf32>
    %c32_i32_20 = arith.constant 32 : i32
    %69 = tpu.dynamic_rotate %65 by %c32_i32_20 dim 1 : vector<2x128xf32>, i32 -> vector<2x128xf32>
    %70 = arith.mulf %67, %56 : vector<2x128xf32>
    %71 = arith.mulf %65, %68 : vector<2x128xf32>
    %72 = arith.addf %70, %71 : vector<2x128xf32>
    %73 = math.tanh %72 : vector<2x128xf32>
    %74 = arith.mulf %69, %73 : vector<2x128xf32>
    %cst_21 = arith.constant dense<0.000000e+00> : vector<2x128xf32>
    %75 = tpu.matmul %74, %1, %cst_21 {dimension_numbers = #tpu.dot_dimension_numbers<[1], [0], [0], [1], [0, 0, 1, 1], [], []>} : vector<2x128xf32>, vector<128x128xf32>, vector<2x128xf32> -> vector<2x128xf32>
    %76 = arith.addf %75, %8 : vector<2x128xf32>
    %77 = arith.negf %76 : vector<2x128xf32>
    %78 = math.exp %77 : vector<2x128xf32>
    %cst_22 = arith.constant 1.000000e+00 : f32
    %79 = vector.broadcast %cst_22 : f32 to vector<2x128xf32>
    %80 = arith.addf %79, %78 : vector<2x128xf32>
    %81 = arith.divf %79, %80 : vector<2x128xf32>
    %82 = math.tanh %76 : vector<2x128xf32>
    %c96_i32_23 = arith.constant 96 : i32
    %83 = tpu.dynamic_rotate %81 by %c96_i32_23 dim 1 : vector<2x128xf32>, i32 -> vector<2x128xf32>
    %c64_i32_24 = arith.constant 64 : i32
    %84 = tpu.dynamic_rotate %82 by %c64_i32_24 dim 1 : vector<2x128xf32>, i32 -> vector<2x128xf32>
    %c32_i32_25 = arith.constant 32 : i32
    %85 = tpu.dynamic_rotate %81 by %c32_i32_25 dim 1 : vector<2x128xf32>, i32 -> vector<2x128xf32>
    %86 = arith.mulf %83, %72 : vector<2x128xf32>
    %87 = arith.mulf %81, %84 : vector<2x128xf32>
    %88 = arith.addf %86, %87 : vector<2x128xf32>
    %89 = math.tanh %88 : vector<2x128xf32>
    %90 = arith.mulf %85, %89 : vector<2x128xf32>
    %cst_26 = arith.constant dense<0.000000e+00> : vector<2x128xf32>
    %91 = tpu.matmul %90, %1, %cst_26 {dimension_numbers = #tpu.dot_dimension_numbers<[1], [0], [0], [1], [0, 0, 1, 1], [], []>} : vector<2x128xf32>, vector<128x128xf32>, vector<2x128xf32> -> vector<2x128xf32>
    %92 = arith.addf %91, %9 : vector<2x128xf32>
    %93 = arith.negf %92 : vector<2x128xf32>
    %94 = math.exp %93 : vector<2x128xf32>
    %cst_27 = arith.constant 1.000000e+00 : f32
    %95 = vector.broadcast %cst_27 : f32 to vector<2x128xf32>
    %96 = arith.addf %95, %94 : vector<2x128xf32>
    %97 = arith.divf %95, %96 : vector<2x128xf32>
    %98 = math.tanh %92 : vector<2x128xf32>
    %c96_i32_28 = arith.constant 96 : i32
    %99 = tpu.dynamic_rotate %97 by %c96_i32_28 dim 1 : vector<2x128xf32>, i32 -> vector<2x128xf32>
    %c64_i32_29 = arith.constant 64 : i32
    %100 = tpu.dynamic_rotate %98 by %c64_i32_29 dim 1 : vector<2x128xf32>, i32 -> vector<2x128xf32>
    %c32_i32_30 = arith.constant 32 : i32
    %101 = tpu.dynamic_rotate %97 by %c32_i32_30 dim 1 : vector<2x128xf32>, i32 -> vector<2x128xf32>
    %102 = arith.mulf %99, %88 : vector<2x128xf32>
    %103 = arith.mulf %97, %100 : vector<2x128xf32>
    %104 = arith.addf %102, %103 : vector<2x128xf32>
    %105 = math.tanh %104 : vector<2x128xf32>
    %106 = arith.mulf %101, %105 : vector<2x128xf32>
    %cst_31 = arith.constant dense<0.000000e+00> : vector<2x128xf32>
    %107 = tpu.matmul %106, %1, %cst_31 {dimension_numbers = #tpu.dot_dimension_numbers<[1], [0], [0], [1], [0, 0, 1, 1], [], []>} : vector<2x128xf32>, vector<128x128xf32>, vector<2x128xf32> -> vector<2x128xf32>
    %108 = arith.addf %107, %10 : vector<2x128xf32>
    %109 = arith.negf %108 : vector<2x128xf32>
    %110 = math.exp %109 : vector<2x128xf32>
    %cst_32 = arith.constant 1.000000e+00 : f32
    %111 = vector.broadcast %cst_32 : f32 to vector<2x128xf32>
    %112 = arith.addf %111, %110 : vector<2x128xf32>
    %113 = arith.divf %111, %112 : vector<2x128xf32>
    %114 = math.tanh %108 : vector<2x128xf32>
    %c96_i32_33 = arith.constant 96 : i32
    %115 = tpu.dynamic_rotate %113 by %c96_i32_33 dim 1 : vector<2x128xf32>, i32 -> vector<2x128xf32>
    %c64_i32_34 = arith.constant 64 : i32
    %116 = tpu.dynamic_rotate %114 by %c64_i32_34 dim 1 : vector<2x128xf32>, i32 -> vector<2x128xf32>
    %c32_i32_35 = arith.constant 32 : i32
    %117 = tpu.dynamic_rotate %113 by %c32_i32_35 dim 1 : vector<2x128xf32>, i32 -> vector<2x128xf32>
    %118 = arith.mulf %115, %104 : vector<2x128xf32>
    %119 = arith.mulf %113, %116 : vector<2x128xf32>
    %120 = arith.addf %118, %119 : vector<2x128xf32>
    %121 = math.tanh %120 : vector<2x128xf32>
    %122 = arith.mulf %117, %121 : vector<2x128xf32>
    %cst_36 = arith.constant dense<0.000000e+00> : vector<2x128xf32>
    %123 = tpu.matmul %122, %1, %cst_36 {dimension_numbers = #tpu.dot_dimension_numbers<[1], [0], [0], [1], [0, 0, 1, 1], [], []>} : vector<2x128xf32>, vector<128x128xf32>, vector<2x128xf32> -> vector<2x128xf32>
    %124 = arith.addf %123, %11 : vector<2x128xf32>
    %125 = arith.negf %124 : vector<2x128xf32>
    %126 = math.exp %125 : vector<2x128xf32>
    %cst_37 = arith.constant 1.000000e+00 : f32
    %127 = vector.broadcast %cst_37 : f32 to vector<2x128xf32>
    %128 = arith.addf %127, %126 : vector<2x128xf32>
    %129 = arith.divf %127, %128 : vector<2x128xf32>
    %130 = math.tanh %124 : vector<2x128xf32>
    %c96_i32_38 = arith.constant 96 : i32
    %131 = tpu.dynamic_rotate %129 by %c96_i32_38 dim 1 : vector<2x128xf32>, i32 -> vector<2x128xf32>
    %c64_i32_39 = arith.constant 64 : i32
    %132 = tpu.dynamic_rotate %130 by %c64_i32_39 dim 1 : vector<2x128xf32>, i32 -> vector<2x128xf32>
    %c32_i32_40 = arith.constant 32 : i32
    %133 = tpu.dynamic_rotate %129 by %c32_i32_40 dim 1 : vector<2x128xf32>, i32 -> vector<2x128xf32>
    %134 = arith.mulf %131, %120 : vector<2x128xf32>
    %135 = arith.mulf %129, %132 : vector<2x128xf32>
    %136 = arith.addf %134, %135 : vector<2x128xf32>
    %137 = math.tanh %136 : vector<2x128xf32>
    %138 = arith.mulf %133, %137 : vector<2x128xf32>
    %139 = vector.extract_strided_slice %138 {offsets = [0, 0], sizes = [2, 32], strides = [1, 1]} : vector<2x128xf32> to vector<2x32xf32>
    %c0_41 = arith.constant 0 : index
    %c0_42 = arith.constant 0 : index
    %c0_43 = arith.constant 0 : index
    %140 = vector.load %arg2[%c0_41, %c0_42, %c0_43] : memref<2x2x32xf32, #tpu.memory_space<vmem>>, vector<1x2x32xf32>
    %141 = vector.shape_cast %140 : vector<1x2x32xf32> to vector<2x32xf32>
    %142 = vector.shape_cast %139 : vector<2x32xf32> to vector<1x2x32xf32>
    tpu.vector_store %arg2[%c0_41, %c0_42, %c0_43], %142 {strides = array<i32>} : memref<2x2x32xf32, #tpu.memory_space<vmem>>, vector<1x2x32xf32>,
    %143 = vector.extract_strided_slice %136 {offsets = [0, 0], sizes = [2, 32], strides = [1, 1]} : vector<2x128xf32> to vector<2x32xf32>
    %c1 = arith.constant 1 : index
    %c0_44 = arith.constant 0 : index
    %c0_45 = arith.constant 0 : index
    %144 = vector.load %arg2[%c1, %c0_44, %c0_45] : memref<2x2x32xf32, #tpu.memory_space<vmem>>, vector<1x2x32xf32>
    %145 = vector.shape_cast %144 : vector<1x2x32xf32> to vector<2x32xf32>
    %146 = vector.shape_cast %143 : vector<2x32xf32> to vector<1x2x32xf32>
    tpu.vector_store %arg2[%c1, %c0_44, %c0_45], %146 {strides = array<i32>} : memref<2x2x32xf32, #tpu.memory_space<vmem>>, vector<1x2x32xf32>,
    return
  }
}

</mosaic_0001>

<bundles_post_ra>
// kernel: tpu_custom_call.1
= control target key start
LH: loop header
LB: loop body
LE: loop exit
PB: predicated region body
PF: predicated region fallthrough
CT: control target
= control target key end

     0   :  { %7 = vsyncpa [#allocation3], 0  ;;  %s1682_s0 = inlined_call_operand.hbm [shape: f32[16,16], index: 0, kind: input, shape index: {}]   ;;  %s1683_s1 = inlined_call_operand.hbm [shape: f32[144,128], index: 1, kind: input, shape index: {}]   ;;  %s1684_s2 = inlined_call_operand.hbm [shape: f32[2,2,32], index: 2, kind: output, shape index: {}]  }
   0x1   :  { %8 = vsyncpa [#allocation6], 0 }
   0x2   :  { %9 = vsyncpa [#allocation4], 0  ;;  %s1338_s9 = smov [#allocation2]  }
   0x3   :  { %s15_s10 = sshll.u32 %s1338_s9, 4  ;;  %s16_s10 = int_to_ptr.vmem [resolvable:$true] %s15_s10 }
   0x4   :  { %s1280_s11 = scalar_lea.vmem %s16_s10, 256  ;;  %p1285_p1 = scmp.lt.s32.totalorder %s16_s10, %s16_s10 }
   0x5   :  { %p1281_p0 = scmp.ne.s32.totalorder %s16_s10, %s1280_s11  ;;  %p1286_p2 = scmp.lt.s32.totalorder %s1280_s11, %s1280_s11 }
   0x7   :  { %p1287_p3 = por %p1286_p2, %p1285_p1 }
   0x9   :  { %p1288_p4 = pnand %p1287_p3, %p1281_p0 }
   0xb   :  { %1291 = shalt.err (!%p1288_p4)
}
   0xc   :  { %s1339_s12 = smov 128   ;;  %s1340_s13 = smov 8  }
   0xd   :  { %21 = dma.hbm_to_vmem [thread:$0]  %s1682_s0, 256, %s16_s10, [#allocation3], %s1339_s12, %s1339_s12, %s1340_s13  }
   0xe   :  { %s1341_s16 = smov [#allocation5]  }
   0xf   :  { %s27_s17 = sshll.u32 %s1341_s16, 4  ;;  %s28_s17 = int_to_ptr.vmem [resolvable:$true] %s27_s17 }
  0x10   :  { %s1300_s18 = scalar_lea.vmem %s28_s17, 2304  ;;  %p1305_p6 = scmp.lt.s32.totalorder %s28_s17, %s28_s17 }
  0x11   :  { %p1301_p5 = scmp.ne.s32.totalorder %s28_s17, %s1300_s18  ;;  %p1306_p7 = scmp.lt.s32.totalorder %s1300_s18, %s1300_s18 }
  0x13   :  { %p1307_p8 = por %p1306_p7, %p1305_p6 }
  0x15   :  { %p1308_p9 = pnand %p1307_p8, %p1301_p5 }
  0x17   :  { %1311 = shalt.err (!%p1308_p9)
}
  0x18   :  { %33 = dma.hbm_to_vmem [thread:$0]  %s1683_s1, 2304, %s28_s17, [#allocation6], %s1339_s12, %s1339_s12, %s1340_s13  }
  0x19   :  { %1332 = dma.done.wait [#allocation3], 256  }
  0x1a   :  { %1333 = vsyncadd [#allocation3], 4294967040 }
  0x1b   :  { %1334 = dma.done.wait [#allocation6], 2304  }
  0x1c   :  { %1335 = vsyncadd [#allocation6], 4294964992  ;;  %vm60_vm0 = vcmask 130048   ;;  %v41_v0 = vld [vmem:[#allocation5 + $0x8] sm:$0xff]  ;;  %v40_v1 = vld [vmem:[#allocation5] sm:$0xff]  ;;  %v1342_v5 = vmov 0.0  }
  0x1d   :  { %v58_v2 = vld [vmem:[#allocation2] sm:$0xff]  ;;  %945 = vmatprep.subr.mxu0 %v41_v0  ;;  %v59_v3 = vld [vmem:[#allocation2 + $0x8] sm:$0xff]  ;;  %v1370_v4 = vld [vmem:[#allocation5 + $0x88] sm:$0xff]  ;;  %952 = vmatprep.subr.mxu1 %v1342_v5  ;;  %vm1343_vm1 = vmmov 0   ;;  %s1344_s0 = smov 32   ;;  %s1345_s1 = smov 96  }
  0x1e   :  { %949 = vmatprep.mubr.msk.f32.mxu0 %vm60_vm0, %v58_v2  ;;  %946 = vmatpush3.msra.mxu0 %v41_v0  ;;  %v1373_v6 = vld [vmem:[#allocation5 + $0x80] sm:$0xff]  ;;  %v1379_v7 = vld [vmem:[#allocation5 + $0x78] sm:$0xff]  ;;  %v1385_v8 = vld [vmem:[#allocation5 + $0x70] sm:$0xff]  ;;  %s1346_s21 = smov 64   ;;  %vm790_vm2 = vcmask 254976   ;;  %s1347_s22 = smov [#allocation7]  }
  0x1f   :  { %947 = vmatprep.subr.mxu0 %v40_v1  ;;  %953 = vmatpush3.msra.mxu1 %v1370_v4  ;;  %v1401_v14 = vld [vmem:[#allocation5 + $0x68] sm:$0xff]  ;;  %v1403_v15 = vld [vmem:[#allocation5 + $0x60] sm:$0xff]  ;;  %v1413_v16 = vld [vmem:[#allocation5 + $0x58] sm:$0xff]  ;;  %s799_s23 = sshll.u32 %s1347_s22, 4  ;;  %s800_s23 = int_to_ptr.vmem [resolvable:$true] %s799_s23 }
  0x20   :  { %948 = vmatpush3.msra.mxu0 %v40_v1  ;;  %954 = vmatprep.subr.mxu1 %v1342_v5  ;;  %v1419_v17 = vld [vmem:[#allocation5 + $0x50] sm:$0xff]  ;;  %v1425_v18 = vld [vmem:[#allocation5 + $0x48] sm:$0xff]  ;;  %v1427_v19 = vld [vmem:[#allocation5 + $0x40] sm:$0xff]  ;;  %s1312_s24 = scalar_lea.vmem %s800_s23, 64  ;;  %p1317_p11 = scmp.lt.s32.totalorder %s800_s23, %s800_s23 }
  0x21   :  { %950 = vmatmul.mubr.msk.f32.vlgmr.msra.gmra.mxu0 %vm60_vm0, %v59_v3  ;;  %987 = vmatprep.subr.mxu0 %v1342_v5  ;;  %v1436_v20 = vld [vmem:[#allocation5 + $0x38] sm:$0xff]  ;;  %v1443_v22 = vld [vmem:[#allocation5 + $0x30] sm:$0xff]  ;;  %v1448_v23 = vld [vmem:[#allocation5 + $0x28] sm:$0xff]  ;;  %p1313_p10 = scmp.ne.s32.totalorder %s800_s23, %s1312_s24  ;;  %p1318_p12 = scmp.lt.s32.totalorder %s1312_s24, %s1312_s24 }
  0x22   :  { %988 = vmatpush3.msra.mxu0 %v1370_v4  ;;  %955 = vmatpush3.msra.mxu1 %v1373_v6  ;;  %v1455_v25 = vld [vmem:[#allocation5 + $0x20] sm:$0xff]  ;;  %v1460_v26 = vld [vmem:[#allocation5 + $0x18] sm:$0xff]  ;;  %v1466_v27 = vld [vmem:[#allocation5 + $0x10] sm:$0xff] }
  0x23   :  { %989 = vmatprep.subr.mxu0 %v1342_v5  ;;  %956 = vmatprep.subr.mxu1 %v1342_v5  ;;  %p1319_p13 = por %p1318_p12, %p1317_p11 }
  0x24   :  { %990 = vmatpush3.msra.mxu0 %v1373_v6  ;;  %957 = vmatpush3.msra.mxu1 %v1379_v7 }
  0x25   :  { %991 = vmatprep.subr.mxu0 %v1342_v5  ;;  %958 = vmatprep.subr.mxu1 %v1342_v5  ;;  %p1320_p0 = pnand %p1319_p13, %p1313_p10 }
  0x26   :  { %992 = vmatpush3.msra.mxu0 %v1379_v7  ;;  %959 = vmatpush3.msra.mxu1 %v1385_v8 }
  0x27   :  { %993 = vmatprep.subr.mxu0 %v1342_v5  ;;  %960 = vmatprep.subr.mxu1 %v1342_v5 }
  0x28   :  { %994 = vmatpush3.msra.mxu0 %v1385_v8  ;;  %961 = vmatpush3.msra.mxu1 %v1401_v14 }
  0x29   :  { %995 = vmatprep.subr.mxu0 %v1342_v5  ;;  %962 = vmatprep.subr.mxu1 %v1342_v5 }
  0x2a   :  { %996 = vmatpush3.msra.mxu0 %v1401_v14  ;;  %963 = vmatpush3.msra.mxu1 %v1403_v15 }
  0x2b   :  { %997 = vmatprep.subr.mxu0 %v1342_v5  ;;  %964 = vmatprep.subr.mxu1 %v1342_v5 }
  0x2c   :  { %998 = vmatpush3.msra.mxu0 %v1403_v15  ;;  %965 = vmatpush3.msra.mxu1 %v1413_v16 }
  0x2d   :  { %999 = vmatprep.subr.mxu0 %v1342_v5  ;;  %966 = vmatprep.subr.mxu1 %v1342_v5 }
  0x2e   :  { %1000 = vmatpush3.msra.mxu0 %v1413_v16  ;;  %967 = vmatpush3.msra.mxu1 %v1419_v17 }
  0x2f   :  { %1001 = vmatprep.subr.mxu0 %v1342_v5  ;;  %968 = vmatprep.subr.mxu1 %v1342_v5 }
  0x30   :  { %1002 = vmatpush3.msra.mxu0 %v1419_v17  ;;  %969 = vmatpush3.msra.mxu1 %v1425_v18 }
  0x31   :  { %1003 = vmatprep.subr.mxu0 %v1342_v5  ;;  %984 = vmatprep.mubr.msk.f32.mxu1 %vm1343_vm1, %v1342_v5 }
  0x32   :  { %970 = vmatprep.subr.mxu1 %v1342_v5  ;;  %1004 = vmatpush3.msra.mxu0 %v1425_v18 }
  0x33   :  { %971 = vmatpush3.msra.mxu1 %v1427_v19  ;;  %1005 = vmatprep.subr.mxu0 %v1342_v5 }
  0x34   :  { %972 = vmatprep.subr.mxu1 %v1342_v5  ;;  %1006 = vmatpush3.msra.mxu0 %v1427_v19 }
  0x35   :  { %973 = vmatpush3.msra.mxu1 %v1436_v20  ;;  %1007 = vmatprep.subr.mxu0 %v1342_v5 }
  0x36   :  { %974 = vmatprep.subr.mxu1 %v1342_v5  ;;  %1008 = vmatpush3.msra.mxu0 %v1436_v20 }
  0x37   :  { %975 = vmatpush3.msra.mxu1 %v1443_v22  ;;  %1009 = vmatprep.subr.mxu0 %v1342_v5 }
  0x38   :  { %976 = vmatprep.subr.mxu1 %v1342_v5  ;;  %1010 = vmatpush3.msra.mxu0 %v1443_v22 }
  0x39   :  { %977 = vmatpush3.msra.mxu1 %v1448_v23  ;;  %1011 = vmatprep.subr.mxu0 %v1342_v5 }
  0x3a   :  { %978 = vmatprep.subr.mxu1 %v1342_v5  ;;  %1012 = vmatpush3.msra.mxu0 %v1448_v23 }
  0x3b   :  { %979 = vmatpush3.msra.mxu1 %v1455_v25  ;;  %1013 = vmatprep.subr.mxu0 %v1342_v5 }
  0x3c   :  { %980 = vmatprep.subr.mxu1 %v1342_v5  ;;  %1014 = vmatpush3.msra.mxu0 %v1455_v25 }
  0x3d   :  { %981 = vmatpush3.msra.mxu1 %v1460_v26  ;;  %1015 = vmatprep.subr.mxu0 %v1342_v5 }
  0x3e   :  { %982 = vmatprep.subr.mxu1 %v1342_v5  ;;  %1016 = vmatpush3.msra.mxu0 %v1460_v26 }
  0x3f   :  { %983 = vmatpush3.msra.mxu1 %v1466_v27  ;;  %1017 = vmatprep.subr.mxu0 %v1342_v5 }
  0x40   :  { %1019 = vmatprep.mubr.msk.f32.mxu0 %vm1343_vm1, %v1342_v5  ;;  %1018 = vmatpush3.msra.mxu0 %v1466_v27 }
  0x41   :  { %1022 = vmatprep.subr.mxu1 %v1342_v5  ;;  %1057 = vmatprep.subr.mxu0 %v1342_v5 }
  0xe1   :  { %v1396_v9 = vpop.f32.mrf.mxu0 }
  0xe3   :  { %v1398_v10 = vpop.f32.mrf.mxu0 }
  0xe4   :  { %v814_v11 = vmul.f32 -1.442695, %v1398_v10  ;;  %v161_v36 = vrot.slane %v1398_v10, 2  ;;  %v251_v53 = vrot.slane %v1398_v10, 4 }
  0xe6   :  { %1208 = vpow2.f32 %v814_v11 }
  0xf3   :  { %v1209_v12 = vpop.eup %1208 }
  0xf4   :  { %v145_v13 = vadd.f32 1.0, %v1209_v12 }
  0xf6   :  { %1210 = vrcp.f32 %v145_v13  ;;  %v341_v13 = vrot.slane %v1398_v10, 6 }
  0xf7   :  { %1212 = vtanh.f32 %v1398_v10 }
 0x103   :  { %v1211_v21 = vpop.eup %1210 }
 0x104   :  { %153 = vrot.lane.b32.xlu1 %v1211_v21, %s1344_s0  ;;  %149 = vrot.lane.b32.xlu0 %v1211_v21, %s1345_s1  ;;  %v1213_v24 = vpop.eup %1212 }
 0x108   :  { %151 = vrot.lane.b32.xlu0 %v1213_v24, %s1346_s21 }
 0x176   :  { %v150_v28 = vpop.permute.xlu0 %149  ;;  %v154_v34 = vpop.permute.xlu1 %153 }
 0x177   :  { %v155_v30 = vmul.f32 0.0, %v150_v28 }
 0x17a   :  { %v152_v29 = vpop.permute.xlu0 %151 }
 0x17b   :  { %v156_v31 = vmul.f32 %v1211_v21, %v152_v29 }
 0x17d   :  { %v157_v32 = vadd.f32 %v156_v31, %v155_v30 }
 0x17f   :  { %1214 = vtanh.f32 %v157_v32 }
 0x18c   :  { %v1215_v33 = vpop.eup %1214 }
 0x18d   :  { %v159_v35 = vmul.f32 %v1215_v33, %v154_v34 }
 0x18f   :  { %985 = vmatmul.mubr.f32.vlgmr.msra.gmra.mxu1 %v159_v35 }
 0x190   :  { %1023 = vmatpush3.msra.mxu1 %v1370_v4  ;;  %1054 = vmatprep.mubr.msk.f32.mxu1 %vm1343_vm1, %v1342_v5 }
 0x191   :  { %1024 = vmatprep.subr.mxu1 %v1342_v5 }
 0x192   :  { %1025 = vmatpush3.msra.mxu1 %v1373_v6 }
 0x193   :  { %1026 = vmatprep.subr.mxu1 %v1342_v5 }
 0x194   :  { %1027 = vmatpush3.msra.mxu1 %v1379_v7 }
 0x195   :  { %1028 = vmatprep.subr.mxu1 %v1342_v5 }
 0x196   :  { %1029 = vmatpush3.msra.mxu1 %v1385_v8 }
 0x197   :  { %1030 = vmatprep.subr.mxu1 %v1342_v5 }
 0x198   :  { %1031 = vmatpush3.msra.mxu1 %v1401_v14 }
 0x199   :  { %1032 = vmatprep.subr.mxu1 %v1342_v5 }
 0x19a   :  { %1033 = vmatpush3.msra.mxu1 %v1403_v15 }
 0x19b   :  { %1034 = vmatprep.subr.mxu1 %v1342_v5 }
 0x19c   :  { %1035 = vmatpush3.msra.mxu1 %v1413_v16 }
 0x19d   :  { %1036 = vmatprep.subr.mxu1 %v1342_v5 }
 0x19e   :  { %1037 = vmatpush3.msra.mxu1 %v1419_v17 }
 0x19f   :  { %1038 = vmatprep.subr.mxu1 %v1342_v5 }
 0x1a0   :  { %1039 = vmatpush3.msra.mxu1 %v1425_v18 }
 0x1a1   :  { %1040 = vmatprep.subr.mxu1 %v1342_v5 }
 0x1a2   :  { %1041 = vmatpush3.msra.mxu1 %v1427_v19 }
 0x1a3   :  { %1042 = vmatprep.subr.mxu1 %v1342_v5 }
 0x1a4   :  { %1043 = vmatpush3.msra.mxu1 %v1436_v20 }
 0x1a5   :  { %1044 = vmatprep.subr.mxu1 %v1342_v5 }
 0x1a6   :  { %1045 = vmatpush3.msra.mxu1 %v1443_v22 }
 0x1a7   :  { %1046 = vmatprep.subr.mxu1 %v1342_v5 }
 0x1a8   :  { %1047 = vmatpush3.msra.mxu1 %v1448_v23 }
 0x1a9   :  { %1048 = vmatprep.subr.mxu1 %v1342_v5 }
 0x1aa   :  { %1049 = vmatpush3.msra.mxu1 %v1455_v25 }
 0x1ab   :  { %1050 = vmatprep.subr.mxu1 %v1342_v5 }
 0x1ac   :  { %1051 = vmatpush3.msra.mxu1 %v1460_v26 }
 0x1ad   :  { %1052 = vmatprep.subr.mxu1 %v1342_v5 }
 0x1ae   :  { %1053 = vmatpush3.msra.mxu1 %v1466_v27 }
 0x1af   :  { %1092 = vmatprep.subr.mxu1 %v1342_v5 }
 0x24f   :  { %v229_v37 = vpop.f32.mrf.mxu1 }
 0x250   :  { %v230_v38 = vadd.f32 %v229_v37, %v161_v36 }
 0x251   :  { %v986_v39 = vpop.f32.mrf.mxu1 }
 0x252   :  { %v815_v40 = vmul.f32 -1.442695, %v230_v38  ;;  %1216 = vtanh.f32 %v230_v38 }
 0x254   :  { %1218 = vpow2.f32 %v815_v40 }
 0x25f   :  { %v1217_v41 = vpop.eup %1216 }
 0x260   :  { %242 = vrot.lane.b32.xlu0 %v1217_v41, %s1346_s21 }
 0x261   :  { %v1219_v42 = vpop.eup %1218 }
 0x262   :  { %v236_v43 = vadd.f32 1.0, %v1219_v42 }
 0x264   :  { %1220 = vrcp.f32 %v236_v43 }
 0x271   :  { %v1221_v44 = vpop.eup %1220 }
 0x272   :  { %240 = vrot.lane.b32.xlu1 %v1221_v44, %s1345_s1 }
 0x276   :  { %244 = vrot.lane.b32.xlu1 %v1221_v44, %s1344_s0 }
 0x2d2   :  { %v243_v45 = vpop.permute.xlu0 %242 }
 0x2d3   :  { %v247_v47 = vmul.f32 %v1221_v44, %v243_v45 }
 0x2e4   :  { %v241_v46 = vpop.permute.xlu1 %240 }
 0x2e5   :  { %v246_v48 = vmul.f32 %v241_v46, %v157_v32 }
 0x2e7   :  { %v248_v49 = vadd.f32 %v247_v47, %v246_v48 }
 0x2e8   :  { %v245_v51 = vpop.permute.xlu1 %244 }
 0x2e9   :  { %1222 = vtanh.f32 %v248_v49 }
 0x2f6   :  { %v1223_v50 = vpop.eup %1222 }
 0x2f7   :  { %v250_v52 = vmul.f32 %v1223_v50, %v245_v51 }
 0x2f9   :  { %1020 = vmatmul.mubr.f32.vlgmr.msra.gmra.mxu0 %v250_v52 }
 0x2fa   :  { %1058 = vmatpush3.msra.mxu0 %v1370_v4  ;;  %1089 = vmatprep.mubr.msk.f32.mxu0 %vm1343_vm1, %v1342_v5 }
 0x2fb   :  { %1059 = vmatprep.subr.mxu0 %v1342_v5 }
 0x2fc   :  { %1060 = vmatpush3.msra.mxu0 %v1373_v6 }
 0x2fd   :  { %1061 = vmatprep.subr.mxu0 %v1342_v5 }
 0x2fe   :  { %1062 = vmatpush3.msra.mxu0 %v1379_v7 }
 0x2ff   :  { %1063 = vmatprep.subr.mxu0 %v1342_v5 }
 0x300   :  { %1064 = vmatpush3.msra.mxu0 %v1385_v8 }
 0x301   :  { %1065 = vmatprep.subr.mxu0 %v1342_v5 }
 0x302   :  { %1066 = vmatpush3.msra.mxu0 %v1401_v14 }
 0x303   :  { %1067 = vmatprep.subr.mxu0 %v1342_v5 }
 0x304   :  { %1068 = vmatpush3.msra.mxu0 %v1403_v15 }
 0x305   :  { %1069 = vmatprep.subr.mxu0 %v1342_v5 }
 0x306   :  { %1070 = vmatpush3.msra.mxu0 %v1413_v16 }
 0x307   :  { %1071 = vmatprep.subr.mxu0 %v1342_v5 }
 0x308   :  { %1072 = vmatpush3.msra.mxu0 %v1419_v17 }
 0x309   :  { %1073 = vmatprep.subr.mxu0 %v1342_v5 }
 0x30a   :  { %1074 = vmatpush3.msra.mxu0 %v1425_v18 }
 0x30b   :  { %1075 = vmatprep.subr.mxu0 %v1342_v5 }
 0x30c   :  { %1076 = vmatpush3.msra.mxu0 %v1427_v19 }
 0x30d   :  { %1077 = vmatprep.subr.mxu0 %v1342_v5 }
 0x30e   :  { %1078 = vmatpush3.msra.mxu0 %v1436_v20 }
 0x30f   :  { %1079 = vmatprep.subr.mxu0 %v1342_v5 }
 0x310   :  { %1080 = vmatpush3.msra.mxu0 %v1443_v22 }
 0x311   :  { %1081 = vmatprep.subr.mxu0 %v1342_v5 }
 0x312   :  { %1082 = vmatpush3.msra.mxu0 %v1448_v23 }
 0x313   :  { %1083 = vmatprep.subr.mxu0 %v1342_v5 }
 0x314   :  { %1084 = vmatpush3.msra.mxu0 %v1455_v25 }
 0x315   :  { %1085 = vmatprep.subr.mxu0 %v1342_v5 }
 0x316   :  { %1086 = vmatpush3.msra.mxu0 %v1460_v26 }
 0x317   :  { %1087 = vmatprep.subr.mxu0 %v1342_v5 }
 0x318   :  { %1088 = vmatpush3.msra.mxu0 %v1466_v27 }
 0x319   :  { %1127 = vmatprep.subr.mxu0 %v1342_v5 }
 0x3b9   :  { %v319_v54 = vpop.f32.mrf.mxu0 }
 0x3ba   :  { %v320_v55 = vadd.f32 %v319_v54, %v251_v53 }
 0x3bb   :  { %v1021_v56 = vpop.f32.mrf.mxu0 }
 0x3bc   :  { %v816_v57 = vmul.f32 -1.442695, %v320_v55  ;;  %1224 = vtanh.f32 %v320_v55 }
 0x3be   :  { %1226 = vpow2.f32 %v816_v57  ;;  %v610_v57 = vrot.slane %v1396_v9, 4 }
 0x3c9   :  { %v1225_v58 = vpop.eup %1224 }
 0x3ca   :  { %332 = vrot.lane.b32.xlu1 %v1225_v58, %s1346_s21 }
 0x3cb   :  { %v1227_v59 = vpop.eup %1226 }
 0x3cc   :  { %v326_v60 = vadd.f32 1.0, %v1227_v59 }
 0x3ce   :  { %1228 = vrcp.f32 %v326_v60 }
 0x3db   :  { %v1229_v61 = vpop.eup %1228 }
 0x3dc   :  { %330 = vrot.lane.b32.xlu0 %v1229_v61, %s1345_s1 }
 0x3e0   :  { %334 = vrot.lane.b32.xlu0 %v1229_v61, %s1344_s0 }
 0x43c   :  { %v333_v62 = vpop.permute.xlu1 %332 }
 0x43d   :  { %v337_v0 = vmul.f32 %v1229_v61, %v333_v62 }
 0x44e   :  { %v331_v63 = vpop.permute.xlu0 %330 }
 0x44f   :  { %v336_v1 = vmul.f32 %v331_v63, %v248_v49 }
 0x451   :  { %v338_v2 = vadd.f32 %v337_v0, %v336_v1 }
 0x452   :  { %v335_v11 = vpop.permute.xlu0 %334 }
 0x453   :  { %1230 = vtanh.f32 %v338_v2 }
 0x460   :  { %v1231_v3 = vpop.eup %1230 }
 0x461   :  { %v340_v12 = vmul.f32 %v1231_v3, %v335_v11 }
 0x463   :  { %1055 = vmatmul.mubr.f32.vlgmr.msra.gmra.mxu1 %v340_v12 }
 0x464   :  { %1093 = vmatpush3.msra.mxu1 %v1370_v4  ;;  %1124 = vmatprep.mubr.msk.f32.mxu1 %vm1343_vm1, %v1342_v5 }
 0x465   :  { %1094 = vmatprep.subr.mxu1 %v1342_v5 }
 0x466   :  { %1095 = vmatpush3.msra.mxu1 %v1373_v6 }
 0x467   :  { %1096 = vmatprep.subr.mxu1 %v1342_v5 }
 0x468   :  { %1097 = vmatpush3.msra.mxu1 %v1379_v7 }
 0x469   :  { %1098 = vmatprep.subr.mxu1 %v1342_v5 }
 0x46a   :  { %1099 = vmatpush3.msra.mxu1 %v1385_v8 }
 0x46b   :  { %1100 = vmatprep.subr.mxu1 %v1342_v5 }
 0x46c   :  { %1101 = vmatpush3.msra.mxu1 %v1401_v14 }
 0x46d   :  { %1102 = vmatprep.subr.mxu1 %v1342_v5 }
 0x46e   :  { %1103 = vmatpush3.msra.mxu1 %v1403_v15 }
 0x46f   :  { %1104 = vmatprep.subr.mxu1 %v1342_v5 }
 0x470   :  { %1105 = vmatpush3.msra.mxu1 %v1413_v16 }
 0x471   :  { %1106 = vmatprep.subr.mxu1 %v1342_v5 }
 0x472   :  { %1107 = vmatpush3.msra.mxu1 %v1419_v17 }
 0x473   :  { %1108 = vmatprep.subr.mxu1 %v1342_v5 }
 0x474   :  { %1109 = vmatpush3.msra.mxu1 %v1425_v18 }
 0x475   :  { %1110 = vmatprep.subr.mxu1 %v1342_v5 }
 0x476   :  { %1111 = vmatpush3.msra.mxu1 %v1427_v19 }
 0x477   :  { %1112 = vmatprep.subr.mxu1 %v1342_v5 }
 0x478   :  { %1113 = vmatpush3.msra.mxu1 %v1436_v20 }
 0x479   :  { %1114 = vmatprep.subr.mxu1 %v1342_v5 }
 0x47a   :  { %1115 = vmatpush3.msra.mxu1 %v1443_v22 }
 0x47b   :  { %1116 = vmatprep.subr.mxu1 %v1342_v5 }
 0x47c   :  { %1117 = vmatpush3.msra.mxu1 %v1448_v23 }
 0x47d   :  { %1118 = vmatprep.subr.mxu1 %v1342_v5 }
 0x47e   :  { %1119 = vmatpush3.msra.mxu1 %v1455_v25 }
 0x47f   :  { %1120 = vmatprep.subr.mxu1 %v1342_v5 }
 0x480   :  { %1121 = vmatpush3.msra.mxu1 %v1460_v26 }
 0x481   :  { %1122 = vmatprep.subr.mxu1 %v1342_v5 }
 0x482   :  { %1123 = vmatpush3.msra.mxu1 %v1466_v27 }
 0x483   :  { %1162 = vmatprep.subr.mxu1 %v1342_v5 }
 0x523   :  { %v409_v21 = vpop.f32.mrf.mxu1 }
 0x524   :  { %v410_v24 = vadd.f32 %v409_v21, %v341_v13 }
 0x525   :  { %v1056_v28 = vpop.f32.mrf.mxu1 }
 0x526   :  { %v817_v29 = vmul.f32 -1.442695, %v410_v24  ;;  %1232 = vtanh.f32 %v410_v24 }
 0x528   :  { %1234 = vpow2.f32 %v817_v29  ;;  %v700_v29 = vrot.slane %v1396_v9, 6 }
 0x533   :  { %v1233_v30 = vpop.eup %1232 }
 0x534   :  { %422 = vrot.lane.b32.xlu0 %v1233_v30, %s1346_s21 }
 0x535   :  { %v1235_v31 = vpop.eup %1234 }
 0x536   :  { %v416_v32 = vadd.f32 1.0, %v1235_v31 }
 0x538   :  { %1236 = vrcp.f32 %v416_v32 }
 0x545   :  { %v1237_v33 = vpop.eup %1236 }
 0x546   :  { %420 = vrot.lane.b32.xlu1 %v1237_v33, %s1345_s1 }
 0x54a   :  { %424 = vrot.lane.b32.xlu1 %v1237_v33, %s1344_s0 }
 0x5a6   :  { %v423_v34 = vpop.permute.xlu0 %422 }
 0x5a7   :  { %v427_v10 = vmul.f32 %v1237_v33, %v423_v34 }
 0x5b8   :  { %v421_v35 = vpop.permute.xlu1 %420 }
 0x5b9   :  { %v426_v36 = vmul.f32 %v421_v35, %v338_v2 }
 0x5bb   :  { %v428_v37 = vadd.f32 %v427_v10, %v426_v36 }
 0x5bc   :  { %v425_v39 = vpop.permute.xlu1 %424 }
 0x5bd   :  { %1238 = vtanh.f32 %v428_v37 }
 0x5ca   :  { %v1239_v38 = vpop.eup %1238 }
 0x5cb   :  { %v430_v40 = vmul.f32 %v1239_v38, %v425_v39 }
 0x5cd   :  { %1090 = vmatmul.mubr.f32.vlgmr.msra.gmra.mxu0 %v430_v40 }
 0x5ce   :  { %1128 = vmatpush3.msra.mxu0 %v1370_v4  ;;  %1159 = vmatprep.mubr.msk.f32.mxu0 %vm1343_vm1, %v1342_v5 }
 0x5cf   :  { %1129 = vmatprep.subr.mxu0 %v1342_v5 }
 0x5d0   :  { %1130 = vmatpush3.msra.mxu0 %v1373_v6 }
 0x5d1   :  { %1131 = vmatprep.subr.mxu0 %v1342_v5 }
 0x5d2   :  { %1132 = vmatpush3.msra.mxu0 %v1379_v7 }
 0x5d3   :  { %1133 = vmatprep.subr.mxu0 %v1342_v5 }
 0x5d4   :  { %1134 = vmatpush3.msra.mxu0 %v1385_v8 }
 0x5d5   :  { %1135 = vmatprep.subr.mxu0 %v1342_v5 }
 0x5d6   :  { %1136 = vmatpush3.msra.mxu0 %v1401_v14 }
 0x5d7   :  { %1137 = vmatprep.subr.mxu0 %v1342_v5 }
 0x5d8   :  { %1138 = vmatpush3.msra.mxu0 %v1403_v15 }
 0x5d9   :  { %1139 = vmatprep.subr.mxu0 %v1342_v5 }
 0x5da   :  { %1140 = vmatpush3.msra.mxu0 %v1413_v16 }
 0x5db   :  { %1141 = vmatprep.subr.mxu0 %v1342_v5 }
 0x5dc   :  { %1142 = vmatpush3.msra.mxu0 %v1419_v17 }
 0x5dd   :  { %1143 = vmatprep.subr.mxu0 %v1342_v5 }
 0x5de   :  { %1144 = vmatpush3.msra.mxu0 %v1425_v18 }
 0x5df   :  { %1145 = vmatprep.subr.mxu0 %v1342_v5 }
 0x5e0   :  { %1146 = vmatpush3.msra.mxu0 %v1427_v19 }
 0x5e1   :  { %1147 = vmatprep.subr.mxu0 %v1342_v5 }
 0x5e2   :  { %1148 = vmatpush3.msra.mxu0 %v1436_v20 }
 0x5e3   :  { %1149 = vmatprep.subr.mxu0 %v1342_v5 }
 0x5e4   :  { %1150 = vmatpush3.msra.mxu0 %v1443_v22 }
 0x5e5   :  { %1151 = vmatprep.subr.mxu0 %v1342_v5 }
 0x5e6   :  { %1152 = vmatpush3.msra.mxu0 %v1448_v23 }
 0x5e7   :  { %1153 = vmatprep.subr.mxu0 %v1342_v5 }
 0x5e8   :  { %1154 = vmatpush3.msra.mxu0 %v1455_v25 }
 0x5e9   :  { %1155 = vmatprep.subr.mxu0 %v1342_v5 }
 0x5ea   :  { %1156 = vmatpush3.msra.mxu0 %v1460_v26 }
 0x5eb   :  { %1157 = vmatprep.subr.mxu0 %v1342_v5 }
 0x5ec   :  { %1158 = vmatpush3.msra.mxu0 %v1466_v27 }
 0x68d   :  { %v497_v41 = vpop.f32.mrf.mxu0 }
 0x68e   :  { %v498_v42 = vadd.f32 %v1396_v9, %v497_v41 }
 0x68f   :  { %v1091_v43 = vpop.f32.mrf.mxu0 }
 0x690   :  { %v818_v44 = vmul.f32 -1.442695, %v498_v42  ;;  %1240 = vtanh.f32 %v498_v42 }
 0x692   :  { %1242 = vpow2.f32 %v818_v44 }
 0x69d   :  { %v1241_v45 = vpop.eup %1240 }
 0x69e   :  { %510 = vrot.lane.b32.xlu1 %v1241_v45, %s1346_s21 }
 0x69f   :  { %v1243_v46 = vpop.eup %1242 }
 0x6a0   :  { %v504_v47 = vadd.f32 1.0, %v1243_v46 }
 0x6a2   :  { %1244 = vrcp.f32 %v504_v47 }
 0x6af   :  { %v1245_v48 = vpop.eup %1244 }
 0x6b0   :  { %508 = vrot.lane.b32.xlu0 %v1245_v48, %s1345_s1 }
 0x6b4   :  { %512 = vrot.lane.b32.xlu0 %v1245_v48, %s1344_s0 }
 0x710   :  { %v511_v49 = vpop.permute.xlu1 %510 }
 0x711   :  { %v515_v51 = vmul.f32 %v1245_v48, %v511_v49 }
 0x722   :  { %v509_v50 = vpop.permute.xlu0 %508 }
 0x723   :  { %v514_v52 = vmul.f32 %v509_v50, %v428_v37 }
 0x725   :  { %v516_v53 = vadd.f32 %v515_v51, %v514_v52 }
 0x726   :  { %v513_v55 = vpop.permute.xlu0 %512 }
 0x727   :  { %1246 = vtanh.f32 %v516_v53 }
 0x734   :  { %v1247_v54 = vpop.eup %1246 }
 0x735   :  { %v518_v56 = vmul.f32 %v1247_v54, %v513_v55 }
 0x737   :  { %1125 = vmatmul.mubr.f32.vlgmr.msra.gmra.mxu1 %v518_v56 }
 0x738   :  { %1163 = vmatpush3.msra.mxu1 %v1370_v4  ;;  %1194 = vmatprep.mubr.msk.f32.mxu1 %vm1343_vm1, %v1342_v5  ;;  %v520_v4 = vrot.slane %v1396_v9, 2 }
 0x739   :  { %1164 = vmatprep.subr.mxu1 %v1342_v5 }
 0x73a   :  { %1165 = vmatpush3.msra.mxu1 %v1373_v6 }
 0x73b   :  { %1166 = vmatprep.subr.mxu1 %v1342_v5 }
 0x73c   :  { %1167 = vmatpush3.msra.mxu1 %v1379_v7 }
 0x73d   :  { %1168 = vmatprep.subr.mxu1 %v1342_v5 }
 0x73e   :  { %1169 = vmatpush3.msra.mxu1 %v1385_v8 }
 0x73f   :  { %1170 = vmatprep.subr.mxu1 %v1342_v5 }
 0x740   :  { %1171 = vmatpush3.msra.mxu1 %v1401_v14 }
 0x741   :  { %1172 = vmatprep.subr.mxu1 %v1342_v5 }
 0x742   :  { %1173 = vmatpush3.msra.mxu1 %v1403_v15 }
 0x743   :  { %1174 = vmatprep.subr.mxu1 %v1342_v5 }
 0x744   :  { %1175 = vmatpush3.msra.mxu1 %v1413_v16 }
 0x745   :  { %1176 = vmatprep.subr.mxu1 %v1342_v5 }
 0x746   :  { %1177 = vmatpush3.msra.mxu1 %v1419_v17 }
 0x747   :  { %1178 = vmatprep.subr.mxu1 %v1342_v5 }
 0x748   :  { %1179 = vmatpush3.msra.mxu1 %v1425_v18 }
 0x749   :  { %1180 = vmatprep.subr.mxu1 %v1342_v5 }
 0x74a   :  { %1181 = vmatpush3.msra.mxu1 %v1427_v19 }
 0x74b   :  { %1182 = vmatprep.subr.mxu1 %v1342_v5 }
 0x74c   :  { %1183 = vmatpush3.msra.mxu1 %v1436_v20 }
 0x74d   :  { %1184 = vmatprep.subr.mxu1 %v1342_v5 }
 0x74e   :  { %1185 = vmatpush3.msra.mxu1 %v1443_v22 }
 0x74f   :  { %1186 = vmatprep.subr.mxu1 %v1342_v5 }
 0x750   :  { %1187 = vmatpush3.msra.mxu1 %v1448_v23 }
 0x751   :  { %1188 = vmatprep.subr.mxu1 %v1342_v5 }
 0x752   :  { %1189 = vmatpush3.msra.mxu1 %v1455_v25 }
 0x753   :  { %1190 = vmatprep.subr.mxu1 %v1342_v5 }
 0x754   :  { %1191 = vmatpush3.msra.mxu1 %v1460_v26 }
 0x755   :  { %1192 = vmatprep.subr.mxu1 %v1342_v5 }
 0x756   :  { %1193 = vmatpush3.msra.mxu1 %v1466_v27 }
 0x7f7   :  { %v588_v6 = vpop.f32.mrf.mxu1 }
 0x7f8   :  { %v589_v7 = vadd.f32 %v588_v6, %v520_v4 }
 0x7f9   :  { %v1126_v8 = vpop.f32.mrf.mxu1 }
 0x7fa   :  { %v819_v14 = vmul.f32 -1.442695, %v589_v7  ;;  %1248 = vtanh.f32 %v589_v7 }
 0x7fc   :  { %1250 = vpow2.f32 %v819_v14 }
 0x807   :  { %v1249_v15 = vpop.eup %1248 }
 0x808   :  { %601 = vrot.lane.b32.xlu0 %v1249_v15, %s1346_s21 }
 0x809   :  { %v1251_v16 = vpop.eup %1250 }
 0x80a   :  { %v595_v17 = vadd.f32 1.0, %v1251_v16 }
 0x80c   :  { %1252 = vrcp.f32 %v595_v17 }
 0x819   :  { %v1253_v18 = vpop.eup %1252 }
 0x81a   :  { %599 = vrot.lane.b32.xlu1 %v1253_v18, %s1345_s1 }
 0x81e   :  { %603 = vrot.lane.b32.xlu1 %v1253_v18, %s1344_s0 }
 0x87a   :  { %v602_v5 = vpop.permute.xlu0 %601 }
 0x87b   :  { %v606_v20 = vmul.f32 %v1253_v18, %v602_v5 }
 0x88c   :  { %v600_v19 = vpop.permute.xlu1 %599 }
 0x88d   :  { %v605_v22 = vmul.f32 %v600_v19, %v516_v53 }
 0x88f   :  { %v607_v23 = vadd.f32 %v606_v20, %v605_v22 }
 0x890   :  { %v604_v26 = vpop.permute.xlu1 %603 }
 0x891   :  { %1254 = vtanh.f32 %v607_v23 }
 0x89e   :  { %v1255_v25 = vpop.eup %1254 }
 0x89f   :  { %v609_v27 = vmul.f32 %v1255_v25, %v604_v26 }
 0x8a1   :  { %1160 = vmatmul.mubr.f32.vlgmr.msra.gmra.mxu0 %v609_v27 }
 0x961   :  { %v678_v58 = vpop.f32.mrf.mxu0 }
 0x962   :  { %v679_v59 = vadd.f32 %v678_v58, %v610_v57 }
 0x963   :  { %v1161_v60 = vpop.f32.mrf.mxu0 }
 0x964   :  { %v820_v61 = vmul.f32 -1.442695, %v679_v59  ;;  %1256 = vtanh.f32 %v679_v59 }
 0x966   :  { %1258 = vpow2.f32 %v820_v61 }
 0x971   :  { %v1257_v62 = vpop.eup %1256 }
 0x972   :  { %691 = vrot.lane.b32.xlu1 %v1257_v62, %s1346_s21 }
 0x973   :  { %v1259_v63 = vpop.eup %1258 }
 0x974   :  { %v685_v0 = vadd.f32 1.0, %v1259_v63 }
 0x976   :  { %1260 = vrcp.f32 %v685_v0 }
 0x983   :  { %v1261_v1 = vpop.eup %1260 }
 0x984   :  { %689 = vrot.lane.b32.xlu0 %v1261_v1, %s1345_s1 }
 0x988   :  { %693 = vrot.lane.b32.xlu0 %v1261_v1, %s1344_s0 }
 0x9e4   :  { %v692_v2 = vpop.permute.xlu1 %691 }
 0x9e5   :  { %v696_v11 = vmul.f32 %v1261_v1, %v692_v2 }
 0x9f6   :  { %v690_v3 = vpop.permute.xlu0 %689 }
 0x9f7   :  { %v695_v12 = vmul.f32 %v690_v3, %v607_v23 }
 0x9f9   :  { %v697_v13 = vadd.f32 %v696_v11, %v695_v12 }
 0x9fa   :  { %v694_v24 = vpop.permute.xlu0 %693 }
 0x9fb   :  { %1262 = vtanh.f32 %v697_v13 }
 0xa08   :  { %v1263_v21 = vpop.eup %1262 }
 0xa09   :  { %v699_v28 = vmul.f32 %v1263_v21, %v694_v24 }
 0xa0b   :  { %1195 = vmatmul.mubr.f32.vlgmr.msra.gmra.mxu1 %v699_v28 }
 0xacb   :  { %v768_v30 = vpop.f32.mrf.mxu1 }
 0xacc   :  { %v769_v31 = vadd.f32 %v768_v30, %v700_v29 }
 0xacd   :  { %v1196_v32 = vpop.f32.mrf.mxu1 }
 0xace   :  { %v821_v33 = vmul.f32 -1.442695, %v769_v31  ;;  %1264 = vtanh.f32 %v769_v31 }
 0xad0   :  { %1266 = vpow2.f32 %v821_v33 }
 0xadb   :  { %v1265_v34 = vpop.eup %1264 }
 0xadc   :  { %781 = vrot.lane.b32.xlu0 %v1265_v34, %s1346_s21 }
 0xadd   :  { %v1267_v35 = vpop.eup %1266 }
 0xade   :  { %v775_v10 = vadd.f32 1.0, %v1267_v35 }
 0xae0   :  { %1268 = vrcp.f32 %v775_v10 }
 0xaed   :  { %v1269_v36 = vpop.eup %1268 }
 0xaee   :  { %779 = vrot.lane.b32.xlu1 %v1269_v36, %s1345_s1 }
 0xaf2   :  { %783 = vrot.lane.b32.xlu1 %v1269_v36, %s1344_s0 }
 0xb4e   :  { %v782_v37 = vpop.permute.xlu0 %781 }
 0xb4f   :  { %v786_v9 = vmul.f32 %v1269_v36, %v782_v37 }
 0xb60   :  { %v780_v38 = vpop.permute.xlu1 %779 }
 0xb61   :  { %v785_v39 = vmul.f32 %v780_v38, %v697_v13 }
 0xb63   :  { %v787_v40 = vadd.f32 %v786_v9, %v785_v39 }
 0xb64   :  { %v784_v42 = vpop.permute.xlu1 %783 }
 0xb65   :  { %1270 = vtanh.f32 %v787_v40  ;;  %793 = vst.msk [vmem:[#allocation7 + $0x2] sm:$0x3] %vm790_vm2, %v787_v40 }
 0xb72   :  { %v1271_v41 = vpop.eup %1270 }
 0xb73   :  { %v789_v43 = vmul.f32 %v1271_v41, %v784_v42 }
 0xb75   :  { %791 = vst.msk [vmem:[#allocation7] sm:$0x3] %vm790_vm2, %v789_v43 }
 0xb76   :  { %1323 = shalt.err (!%p1320_p0)
}
 0xb77   :  { %s1348_s25 = smov 2  }
 0xb78   :  { %805 = dma.vmem_to_hbm [thread:$0]  %s800_s23, 64, %s1684_s2, [#allocation4], %s1344_s0, %s1344_s0, %s1348_s25  }
 0xb79   :  { %1336 = dma.done.wait [#allocation4], 64  }
 0xb7a   :  { %1337 = vsyncadd [#allocation4], 4294967232 }
 0xb7b   :  { %809 = vsyncpa [#allocation3], 1 }
 0xb7c   :  { %810 = vsyncpa [#allocation6], 1 }
 0xb7d   :  { %811 = vsyncpa [#allocation4], 1 }

</bundles_post_ra>
